<compile_context>
chip_gen: v6e
topology: v6e:2x2x1
jax: 0.10.0
libtpu: 0.0.40
codegen_flags: <defaults>
</compile_context>

<pallas_src>
import functools

import jax
import jax.numpy as jnp
from jax.experimental import pallas as pl
from jax.experimental.pallas import tpu as pltpu


def classifier_kernel(x_ref, w1_ref, b1_ref, w2_ref, b2_ref, out_ref, *, fc1_on_mxu):
    x = x_ref[...]                                   # (TB, D) f32

    # ---- fc1 ----
    if fc1_on_mxu:
        # Throughput path: K=3 matmul on the MXU (vextended slot); VALU/vst stay free.
        h = jnp.dot(x, w1_ref[...], preferred_element_type=jnp.float32) + b1_ref[...]
    else:
        # Single-tile latency path: tiny-K matmul as VPU broadcast-FMAs.
        h = b1_ref[...]                              # (1, H) -> broadcasts to (TB, H)
        for k in range(x.shape[1]):                  # static unroll (D = latent_dim = 3)
            h = h + x[:, k:k + 1] * w1_ref[k:k + 1, :]
    h = jnp.maximum(h, 0.0)                          # ReLU

    # ---- fc2: K=256 matmul on the MXU ----
    logits = jnp.dot(h, w2_ref[...], preferred_element_type=jnp.float32) + b2_ref[...]

    # ---- numerically-stable softmax over the class axis (exact divide) ----
    m = jnp.max(logits, axis=-1, keepdims=True)
    e = jnp.exp(logits - m)                          # EUP
    out_ref[...] = e / jnp.sum(e, axis=-1, keepdims=True)


def _round_up(n, m):
    return ((n + m - 1) // m) * m


def _pick_tile(batch, tb):
    tb = _round_up(max(tb, 8), 8)
    tb = min(tb, _round_up(batch, 8))          # never tile past the (rounded) batch
    if batch > 512:                            # large B: guarantee >= 2 grid steps (v7x megacore)
        tb = min(tb, _round_up(-(-batch // 2), 8))
    return max(tb, 8)


@functools.partial(jax.jit, static_argnames=("tb",))
def classifier_forward(x, w1, b1, w2, b2, *, tb=2048):
    B, D = x.shape
    H = w1.shape[1]
    C = w2.shape[1]
    tb = _pick_tile(B, tb)

    kernel = functools.partial(classifier_kernel, fc1_on_mxu=(tb >= 512))

    return pl.pallas_call(
        kernel,
        out_shape=jax.ShapeDtypeStruct((B, C), jnp.float32),
        grid=(pl.cdiv(B, tb),),                        # ragged last block: masked writes
        in_specs=[
            pl.BlockSpec((tb, D), lambda i: (i, 0)),   # x: streamed per batch tile
            pl.BlockSpec((D, H), lambda i: (0, 0)),    # w1: VMEM-resident across grid
            pl.BlockSpec((1, H), lambda i: (0, 0)),    # b1: resident
            pl.BlockSpec((H, C), lambda i: (0, 0)),    # w2: resident
            pl.BlockSpec((1, C), lambda i: (0, 0)),    # b2: resident
        ],
        out_specs=pl.BlockSpec((tb, C), lambda i: (i, 0)),
        compiler_params=pltpu.CompilerParams(
            dimension_semantics=("parallel",),         # shard batch tiles across TCs (v7x)
            vmem_limit_bytes=32 * 1024 * 1024,         # explicit: > v5e's 16 MiB default,
        ),                                             # well under v7x's 64 MiB physical
    )(x, w1, b1, w2, b2)


def init_params(key, latent_dim=3, hidden=256, n_class=7):
    """Deterministic init mimicking nn.Linear defaults (uniform +/- 1/sqrt(fan_in))."""
    k1, k2, k3, k4 = jax.random.split(key, 4)
    bound1 = 1.0 / jnp.sqrt(latent_dim)
    bound2 = 1.0 / jnp.sqrt(hidden)
    # stored transposed vs. torch: (in, out)
    w1 = jax.random.uniform(k1, (latent_dim, hidden), jnp.float32, -bound1, bound1)
    b1 = jax.random.uniform(k2, (1, hidden), jnp.float32, -bound1, bound1)
    w2 = jax.random.uniform(k3, (hidden, n_class), jnp.float32, -bound2, bound2)
    b2 = jax.random.uniform(k4, (1, n_class), jnp.float32, -bound2, bound2)
    return w1, b1, w2, b2


def _reference(x, w1, b1, w2, b2):
    h = jnp.maximum(x @ w1 + b1, 0.0)
    return jax.nn.softmax(h @ w2 + b2, axis=1)


if __name__ == "__main__":
    latent_dim, hidden, n_class = 3, 256, 7

    key = jax.random.PRNGKey(0)
    k_x, k_p, k_x2, k_x3 = jax.random.split(key, 4)
    w1, b1, w2, b2 = init_params(k_p, latent_dim, hidden, n_class)

    # --- small shape: single tile, VPU fc1 path ---
    x = jax.random.normal(k_x, (8, latent_dim), dtype=jnp.float32)
    out = jax.block_until_ready(classifier_forward(x, w1, b1, w2, b2))
    ref = _reference(x, w1, b1, w2, b2)
    assert out.shape == (8, n_class)
    assert jnp.allclose(out, ref, atol=2e-3, rtol=2e-3)
    assert jnp.allclose(jnp.sum(out, axis=1), 1.0, atol=1e-3)

    # --- ragged grid: B=520 -> 2 steps of 264 rows, masked final block ---
    x_big = jax.random.normal(k_x2, (520, latent_dim), dtype=jnp.float32)
    out_big = jax.block_until_ready(classifier_forward(x_big, w1, b1, w2, b2))
    assert out_big.shape == (520, n_class)
    assert jnp.allclose(out_big, _reference(x_big, w1, b1, w2, b2), atol=2e-3, rtol=2e-3)

    # --- larger batch: 2 steps of 1024 rows, MXU fc1 path, both TCs busy on v7x ---
    x_mxu = jax.random.normal(k_x3, (2048, latent_dim), dtype=jnp.float32)
    out_mxu = jax.block_until_ready(classifier_forward(x_mxu, w1, b1, w2, b2))
    assert out_mxu.shape == (2048, n_class)
    assert jnp.allclose(out_mxu, _reference(x_mxu, w1, b1, w2, b2), atol=2e-3, rtol=2e-3)

    print("KERNEL_OK")
</pallas_src>

<mosaic_0001>
module attributes {stable_mosaic.version = 11 : i64} {
  func.func @classifier_kernel(%arg0: i32, %arg1: memref<8x3xf32, #tpu.memory_space<vmem>>, %arg2: memref<3x256xf32, #tpu.memory_space<vmem>>, %arg3: memref<1x256xf32, #tpu.memory_space<vmem>>, %arg4: memref<256x7xf32, #tpu.memory_space<vmem>>, %arg5: memref<1x7xf32, #tpu.memory_space<vmem>>, %arg6: memref<8x7xf32, #tpu.memory_space<vmem>>) attributes {dimension_semantics = [#tpu.dimension_semantics<parallel>], iteration_bounds = array<i64: 1>, scalar_prefetch = 0 : i64, scratch_operands = 0 : i64, tpu.core_type = #tpu.core_type<tc>, window_params = [{transform_indices = @transform_0, window_bounds = array<i64: 8, 3>}, {pipeline_mode = #tpu.pipeline_mode<synchronous>, transform_indices = @transform_1, window_bounds = array<i64: 3, 256>}, {pipeline_mode = #tpu.pipeline_mode<synchronous>, transform_indices = @transform_2, window_bounds = array<i64: 1, 256>}, {pipeline_mode = #tpu.pipeline_mode<synchronous>, transform_indices = @transform_3, window_bounds = array<i64: 256, 7>}, {pipeline_mode = #tpu.pipeline_mode<synchronous>, transform_indices = @transform_4, window_bounds = array<i64: 1, 7>}, {transform_indices = @transform_5, window_bounds = array<i64: 8, 7>}]} {
    %c0 = arith.constant 0 : index
    %c0_0 = arith.constant 0 : index
    %0 = vector.load %arg1[%c0, %c0_0] : memref<8x3xf32, #tpu.memory_space<vmem>>, vector<8x3xf32>
    %c0_1 = arith.constant 0 : index
    %c0_2 = arith.constant 0 : index
    %1 = vector.load %arg3[%c0_1, %c0_2] : memref<1x256xf32, #tpu.memory_space<vmem>>, vector<1x256xf32>
    %2 = vector.extract_strided_slice %0 {offsets = [0, 0], sizes = [8, 1], strides = [1, 1]} : vector<8x3xf32> to vector<8x1xf32>
    %c0_3 = arith.constant 0 : index
    %c0_4 = arith.constant 0 : index
    %3 = vector.load %arg2[%c0_3, %c0_4] : memref<3x256xf32, #tpu.memory_space<vmem>>, vector<1x256xf32>
    %4 = vector.broadcast %2 : vector<8x1xf32> to vector<8x256xf32>
    %5 = vector.broadcast %3 : vector<1x256xf32> to vector<8x256xf32>
    %6 = arith.mulf %4, %5 : vector<8x256xf32>
    %7 = vector.broadcast %1 : vector<1x256xf32> to vector<8x256xf32>
    %8 = arith.addf %7, %6 : vector<8x256xf32>
    %9 = vector.extract_strided_slice %0 {offsets = [0, 1], sizes = [8, 1], strides = [1, 1]} : vector<8x3xf32> to vector<8x1xf32>
    %c1 = arith.constant 1 : index
    %c0_5 = arith.constant 0 : index
    %10 = vector.load %arg2[%c1, %c0_5] : memref<3x256xf32, #tpu.memory_space<vmem>>, vector<1x256xf32>
    %11 = vector.broadcast %9 : vector<8x1xf32> to vector<8x256xf32>
    %12 = vector.broadcast %10 : vector<1x256xf32> to vector<8x256xf32>
    %13 = arith.mulf %11, %12 : vector<8x256xf32>
    %14 = arith.addf %8, %13 : vector<8x256xf32>
    %15 = vector.extract_strided_slice %0 {offsets = [0, 2], sizes = [8, 1], strides = [1, 1]} : vector<8x3xf32> to vector<8x1xf32>
    %c2 = arith.constant 2 : index
    %c0_6 = arith.constant 0 : index
    %16 = vector.load %arg2[%c2, %c0_6] : memref<3x256xf32, #tpu.memory_space<vmem>>, vector<1x256xf32>
    %17 = vector.broadcast %15 : vector<8x1xf32> to vector<8x256xf32>
    %18 = vector.broadcast %16 : vector<1x256xf32> to vector<8x256xf32>
    %19 = arith.mulf %17, %18 : vector<8x256xf32>
    %20 = arith.addf %14, %19 : vector<8x256xf32>
    %cst = arith.constant 0.000000e+00 : f32
    %21 = vector.broadcast %cst : f32 to vector<8x256xf32>
    %22 = arith.maximumf %20, %21 : vector<8x256xf32>
    %c0_7 = arith.constant 0 : index
    %c0_8 = arith.constant 0 : index
    %23 = vector.load %arg4[%c0_7, %c0_8] : memref<256x7xf32, #tpu.memory_space<vmem>>, vector<256x7xf32>
    %cst_9 = arith.constant dense<0.000000e+00> : vector<8x7xf32>
    %24 = tpu.matmul %22, %23, %cst_9 {dimension_numbers = #tpu.dot_dimension_numbers<[1], [0], [0], [1], [0, 0, 1, 1], [], []>} : vector<8x256xf32>, vector<256x7xf32>, vector<8x7xf32> -> vector<8x7xf32>
    %c0_10 = arith.constant 0 : index
    %c0_11 = arith.constant 0 : index
    %25 = vector.load %arg5[%c0_10, %c0_11] : memref<1x7xf32, #tpu.memory_space<vmem>>, vector<1x7xf32>
    %26 = vector.broadcast %25 : vector<1x7xf32> to vector<8x7xf32>
    %27 = arith.addf %24, %26 : vector<8x7xf32>
    %cst_12 = arith.constant dense<0xFF800000> : vector<8xf32>
    %28 = vector.multi_reduction <maximumf>, %27, %cst_12 [1] : vector<8x7xf32> to vector<8xf32>
    %29 = vector.shape_cast %28 : vector<8xf32> to vector<8x1xf32>
    %30 = vector.broadcast %29 : vector<8x1xf32> to vector<8x7xf32>
    %31 = arith.subf %27, %30 : vector<8x7xf32>
    %32 = math.exp %31 : vector<8x7xf32>
    %cst_13 = arith.constant dense<0.000000e+00> : vector<8xf32>
    %33 = vector.multi_reduction <add>, %32, %cst_13 [1] : vector<8x7xf32> to vector<8xf32>
    %34 = vector.shape_cast %33 : vector<8xf32> to vector<8x1xf32>
    %35 = vector.broadcast %34 : vector<8x1xf32> to vector<8x7xf32>
    %36 = arith.divf %32, %35 : vector<8x7xf32>
    %c0_14 = arith.constant 0 : index
    %c0_15 = arith.constant 0 : index
    %37 = vector.load %arg6[%c0_14, %c0_15] : memref<8x7xf32, #tpu.memory_space<vmem>>, vector<8x7xf32>
    tpu.vector_store %arg6[%c0_14, %c0_15], %36 {strides = array<i32>} : memref<8x7xf32, #tpu.memory_space<vmem>>, vector<8x7xf32>,
    return
  }
  func.func @transform_0(%arg0: i32) -> (i32, i32) {
    %c0_i32 = arith.constant 0 : i32
    %c0_i32_0 = arith.constant 0 : i32
    return %arg0, %c0_i32 : i32, i32
  }
  func.func @transform_1(%arg0: i32) -> (i32, i32) {
    %c0_i32 = arith.constant 0 : i32
    %c0_i32_0 = arith.constant 0 : i32
    %c0_i32_1 = arith.constant 0 : i32
    return %c0_i32, %c0_i32_0 : i32, i32
  }
  func.func @transform_2(%arg0: i32) -> (i32, i32) {
    %c0_i32 = arith.constant 0 : i32
    %c0_i32_0 = arith.constant 0 : i32
    %c0_i32_1 = arith.constant 0 : i32
    return %c0_i32, %c0_i32_0 : i32, i32
  }
  func.func @transform_3(%arg0: i32) -> (i32, i32) {
    %c0_i32 = arith.constant 0 : i32
    %c0_i32_0 = arith.constant 0 : i32
    %c0_i32_1 = arith.constant 0 : i32
    return %c0_i32, %c0_i32_0 : i32, i32
  }
  func.func @transform_4(%arg0: i32) -> (i32, i32) {
    %c0_i32 = arith.constant 0 : i32
    %c0_i32_0 = arith.constant 0 : i32
    %c0_i32_1 = arith.constant 0 : i32
    return %c0_i32, %c0_i32_0 : i32, i32
  }
  func.func @transform_5(%arg0: i32) -> (i32, i32) {
    %c0_i32 = arith.constant 0 : i32
    %c0_i32_0 = arith.constant 0 : i32
    return %arg0, %c0_i32 : i32, i32
  }
}

</mosaic_0001>

<bundles_post_ra>
// kernel: classifier_forward.1
= control target key start
LH: loop header
LB: loop body
LE: loop exit
PB: predicated region body
PF: predicated region fallthrough
CT: control target
= control target key end

     0   :  { %v307_v2 = vmov 0   ;;  %v308_v3 = vmov 2   ;;  %v309_v9 = vmov 1   ;;  %s461_s0 = inlined_call_operand.vmem [shape: f32[8,3], index: 0, kind: input, shape index: {}]   ;;  %s462_s1 = inlined_call_operand.vmem [shape: f32[3,256], index: 1, kind: input, shape index: {}]   ;;  %s463_s2 = inlined_call_operand.vmem [shape: f32[1,256], index: 2, kind: input, shape index: {}]   ;;  %s464_s3 = inlined_call_operand.vmem [shape: f32[256,7], index: 3, kind: input, shape index: {}]   ;;  %s465_s4 = inlined_call_operand.vmem [shape: f32[1,7], index: 4, kind: input, shape index: {}]   ;;  %s466_s5 = inlined_call_operand.hbm [shape: f32[8,7], index: 5, kind: output, shape index: {}]  }
   0x1   :  { %v21_v0 = vld [vmem:[%s461_s0] sm:$0xff]  ;;  %v130_v1 = vld [vmem:[%s464_s3 + $0xf8] sm:$0xff]  ;;  %277 = vset.pattern.permute.xlu0 %v307_v2  ;;  %279 = vset.pattern.permute.xlu1 %v308_v3  ;;  %v129_v5 = vld [vmem:[%s464_s3 + $0xf0] sm:$0xff] }
   0x2   :  { %v114_v4 = vld [vmem:[%s464_s3 + $0x78] sm:$0xff]  ;;  %26 = vperm.xlu0 %277, %v21_v0   ;;  %79 = vperm.xlu1 %279, %v21_v0   ;;  %v113_v6 = vld [vmem:[%s464_s3 + $0x70] sm:$0xff]  ;;  %v128_v7 = vld [vmem:[%s464_s3 + $0xe8] sm:$0xff] }
   0x3   :  { %238 = vmatprep.subr.mxu0 %v130_v1  ;;  %v112_v8 = vld [vmem:[%s464_s3 + $0x68] sm:$0xff]  ;;  %v127_v10 = vld [vmem:[%s464_s3 + $0xe0] sm:$0xff]  ;;  %v126_v12 = vld [vmem:[%s464_s3 + $0xd8] sm:$0xff] }
   0x4   :  { %239 = vmatpush3.msra.mxu0 %v114_v4  ;;  %v111_v11 = vld [vmem:[%s464_s3 + $0x60] sm:$0xff]  ;;  %v110_v13 = vld [vmem:[%s464_s3 + $0x58] sm:$0xff]  ;;  %v125_v14 = vld [vmem:[%s464_s3 + $0xd0] sm:$0xff] }
   0x5   :  { %240 = vmatprep.subr.mxu0 %v129_v5  ;;  %v109_v15 = vld [vmem:[%s464_s3 + $0x50] sm:$0xff]  ;;  %v124_v16 = vld [vmem:[%s464_s3 + $0xc8] sm:$0xff] }
   0x6   :  { %278 = vset.pattern.permute.xlu0 %v309_v9  ;;  %241 = vmatpush3.msra.mxu0 %v113_v6 }
   0x7   :  { %58 = vperm.xlu0 %278, %v21_v0   ;;  %242 = vmatprep.subr.mxu0 %v128_v7 }
   0x8   :  { %243 = vmatpush3.msra.mxu0 %v112_v8 }
   0x9   :  { %244 = vmatprep.subr.mxu0 %v127_v10 }
   0xa   :  { %245 = vmatpush3.msra.mxu0 %v111_v11 }
   0xb   :  { %246 = vmatprep.subr.mxu0 %v126_v12  ;;  %280 = vset.pattern.permute.xlu0 %v308_v3 }
   0xc   :  { %247 = vmatpush3.msra.mxu0 %v110_v13 }
   0xd   :  { %10 = vsyncpa [#allocation3], 0  ;;  %248 = vmatprep.subr.mxu0 %v125_v14  ;;  %v108_v17 = vld [vmem:[%s464_s3 + $0x48] sm:$0xff]  ;;  %v123_v18 = vld [vmem:[%s464_s3 + $0xc0] sm:$0xff]  ;;  %v30_v36 = vlaneseq  ;;  %vm208_vm0 = vcmask 56320   ;;  %s310_s13 = smov [#allocation2]  }
   0xe   :  { %249 = vmatpush3.msra.mxu0 %v109_v15  ;;  %v107_v19 = vld [vmem:[%s464_s3 + $0x40] sm:$0xff]  ;;  %v122_v20 = vld [vmem:[%s464_s3 + $0xb8] sm:$0xff]  ;;  %v121_v22 = vld [vmem:[%s464_s3 + $0xb0] sm:$0xff]  ;;  %s227_s14 = sshll.u32 %s310_s13, 4  ;;  %s228_s14 = int_to_ptr.vmem [resolvable:$true] %s227_s14 }
   0xf   :  { %250 = vmatprep.subr.mxu0 %v124_v16  ;;  %v106_v21 = vld [vmem:[%s464_s3 + $0x38] sm:$0xff]  ;;  %v105_v23 = vld [vmem:[%s464_s3 + $0x30] sm:$0xff]  ;;  %v120_v24 = vld [vmem:[%s464_s3 + $0xa8] sm:$0xff]  ;;  %v31_v37 = vshrl.u32 %v30_v36, 7  ;;  %p290_p1 = scmp.lt.s32.totalorder %s228_s14, %s228_s14 }
  0x10   :  { %251 = vmatpush3.msra.mxu0 %v108_v17  ;;  %v104_v25 = vld [vmem:[%s464_s3 + $0x28] sm:$0xff]  ;;  %v119_v26 = vld [vmem:[%s464_s3 + $0xa0] sm:$0xff]  ;;  %v118_v28 = vld [vmem:[%s464_s3 + $0x98] sm:$0xff] }
  0x11   :  { %252 = vmatprep.subr.mxu0 %v123_v18  ;;  %v103_v27 = vld [vmem:[%s464_s3 + $0x20] sm:$0xff]  ;;  %v102_v29 = vld [vmem:[%s464_s3 + $0x18] sm:$0xff]  ;;  %v117_v30 = vld [vmem:[%s464_s3 + $0x90] sm:$0xff]  ;;  %v32_v38 = vsub.s32 0, %v31_v37  ;;  %v36_v39 = vsub.s32 1, %v31_v37 }
  0x12   :  { %253 = vmatpush3.msra.mxu0 %v107_v19  ;;  %v101_v31 = vld [vmem:[%s464_s3 + $0x10] sm:$0xff]  ;;  %v116_v32 = vld [vmem:[%s464_s3 + $0x88] sm:$0xff]  ;;  %v115_v34 = vld [vmem:[%s464_s3 + $0x80] sm:$0xff] }
  0x13   :  { %254 = vmatprep.subr.mxu0 %v122_v20  ;;  %v100_v33 = vld [vmem:[%s464_s3 + $0x8] sm:$0xff]  ;;  %v99_v35 = vld [vmem:[%s464_s3] sm:$0xff] }
  0x14   :  { %255 = vmatpush3.msra.mxu0 %v106_v21  ;;  %v23_v40 = vld [vmem:[%s462_s1] ss:$4 sm:$0x3]  ;;  %v236_v44 = vld [vmem:[%s462_s1 + $0x2] ss:$4 sm:$0x3] }
  0x15   :  { %256 = vmatprep.subr.mxu0 %v121_v22  ;;  %v22_v41 = vld [vmem:[%s463_s2] sm:$0x3]  ;;  %v33_v42 = vrot.slane %v23_v40, %v32_v38  ;;  %v37_v43 = vrot.slane %v23_v40, %v36_v39  ;;  %v86_v49 = vrot.slane %v236_v44, %v32_v38  ;;  %v90_v50 = vrot.slane %v236_v44, %v36_v39 }
  0x16   :  { %257 = vmatpush3.msra.mxu0 %v105_v23  ;;  %v235_v45 = vld [vmem:[%s462_s1 + $0x1] ss:$4 sm:$0x3]  ;;  %v46_v47 = vrot.slane %v22_v41, %v32_v38  ;;  %v50_v48 = vrot.slane %v22_v41, %v36_v39  ;;  %v237_v7 = vld [vmem:[%s465_s4] ss:$0 sm:$0xff]  ;;  %s285_s4 = scalar_lea.vmem %s228_s14, 128 }
  0x17   :  { %258 = vmatprep.subr.mxu0 %v120_v24  ;;  %v65_v53 = vrot.slane %v235_v45, %v32_v38  ;;  %v69_v54 = vrot.slane %v235_v45, %v36_v39  ;;  %p286_p0 = scmp.ne.s32.totalorder %s228_s14, %s285_s4  ;;  %p291_p2 = scmp.lt.s32.totalorder %s285_s4, %s285_s4 }
  0x18   :  { %259 = vmatpush3.msra.mxu0 %v104_v25 }
  0x19   :  { %260 = vmatprep.subr.mxu0 %v119_v26  ;;  %p292_p3 = por %p291_p2, %p290_p1 }
  0x1a   :  { %261 = vmatpush3.msra.mxu0 %v103_v27 }
  0x1b   :  { %262 = vmatprep.subr.mxu0 %v118_v28  ;;  %p293_p4 = pnand %p292_p3, %p286_p0 }
  0x1c   :  { %263 = vmatpush3.msra.mxu0 %v102_v29 }
  0x1d   :  { %264 = vmatprep.subr.mxu0 %v117_v30 }
  0x1e   :  { %265 = vmatpush3.msra.mxu0 %v101_v31 }
  0x1f   :  { %266 = vmatprep.subr.mxu0 %v116_v32 }
  0x20   :  { %267 = vmatpush3.msra.mxu0 %v100_v33 }
  0x21   :  { %268 = vmatprep.subr.mxu0 %v115_v34 }
  0x22   :  { %269 = vmatpush3.msra.mxu0 %v99_v35 }
  0x7d   :  { %v27_v46 = vpop.permute.xlu0 %26  ;;  %v80_v55 = vpop.permute.xlu1 %79 }
  0x7e   :  { %v40_v51 = vmul.f32 %v33_v42, %v27_v46  ;;  %v41_v52 = vmul.f32 %v37_v43, %v27_v46  ;;  %v93_v57 = vmul.f32 %v86_v49, %v80_v55  ;;  %v94_v58 = vmul.f32 %v90_v50, %v80_v55 }
  0x80   :  { %v53_v59 = vadd.f32 %v46_v47, %v40_v51  ;;  %v54_v60 = vadd.f32 %v50_v48, %v41_v52 }
  0x82   :  { %v59_v56 = vpop.permute.xlu0 %58 }
  0x83   :  { %v72_v61 = vmul.f32 %v65_v53, %v59_v56  ;;  %v73_v62 = vmul.f32 %v69_v54, %v59_v56 }
  0x85   :  { %v74_v63 = vadd.f32 %v72_v61, %v53_v59  ;;  %v75_v0 = vadd.f32 %v73_v62, %v54_v60 }
  0x87   :  { %v95_v1 = vadd.f32 %v93_v57, %v74_v63  ;;  %v96_v2 = vadd.f32 %v94_v58, %v75_v0 }
  0x89   :  { %v98_v3 = vmax.f32 %v96_v2, 0.0  ;;  %v97_v4 = vmax.f32 %v95_v1, 0.0 }
  0x8b   :  { %202 = vmatprep.mubr.f32.mxu0 %v98_v3 }
  0x8c   :  { %203 = vmatmul.mubr.f32.vlgmr.msra.gmra.mxu0 %v97_v4 }
 0x14c   :  { %v270_v5 = vpop.f32.mrf.mxu0 }
 0x14e   :  { %v271_v6 = vpop.f32.mrf.mxu0 }
 0x14f   :  { %v272_v8 = vadd.f32 %v271_v6, %v270_v5 }
 0x151   :  { %v205_v9 = vadd.f32 %v272_v8, %v237_v7 }
 0x153   :  { %v209_v10 = vsel %vm208_vm0, %v205_v9, -inf }
 0x154   :  { %210 = vmax.xlane.f32.xlu1 %v209_v10 }
 0x1dd   :  { %v211_v11 = vpop.xlane.xlu1 %210 }
 0x1de   :  { %v212_v12 = vsub.f32 %v205_v9, %v211_v11 }
 0x1e0   :  { %v213_v13 = vmul.f32 1.442695, %v212_v12 }
 0x1e2   :  { %281 = vpow2.f32 %v213_v13 }
 0x1ef   :  { %v282_v14 = vpop.eup %281 }
 0x1f0   :  { %v215_v15 = vsel %vm208_vm0, %v282_v14, 0.0 }
 0x1f1   :  { %216 = vadd.xlane.f32.xlu0 %v215_v15 }
 0x27a   :  { %v217_v16 = vpop.xlane.xlu0 %216 }
 0x27b   :  { %283 = vrcp.f32 %v217_v16 }
 0x288   :  { %v284_v17 = vpop.eup %283 }
 0x289   :  { %v219_v18 = vmul.f32 %v284_v17, %v282_v14 }
 0x28b   :  { %220 = vst.msk [vmem:[#allocation2] sm:$0xff] %vm208_vm0, %v219_v18 }
 0x28c   :  { %296 = shalt.err (!%p293_p4)
}
 0x28d   :  { %230 = dma.vmem_to_hbm [thread:$0]  %s228_s14, 128, %s466_s5, [#allocation3]  }
 0x28e   :  { %305 = dma.done.wait [#allocation3], 128  }
 0x28f   :  { %306 = vsyncadd [#allocation3], 4294967168 }
 0x290   :  { %234 = vsyncpa [#allocation3], 1 }

</bundles_post_ra>
